<compile_context>
chip_gen: v7x
topology: tpu7x:2x2x1
jax: 0.10.0
libtpu: 0.0.40
codegen_flags: <defaults>
</compile_context>

<pallas_src>
import functools

import jax
import jax.numpy as jnp
from jax.experimental import pallas as pl
from jax.experimental.pallas import tpu as pltpu


# ---------------------------------------------------------------------------
# Weight pre-packing: fold the 3 width taps of the 3x3 kernel into a banded
# matrix so the conv over width becomes a single lane-dense matmul.
# ---------------------------------------------------------------------------
def _make_banded_weights(w_hwio, W):
    """w_hwio: (3, 3, Cin, Cout) -> B: (3, W*Cin, W*Cout).

    With xp the height-padded input rows flattened as (H+2, W*Cin):
        y[h, wo*Cout + co] = sum_kh (xp[kh + h] @ B[kh])[wo*Cout + co]
    implements a 3x3 "same" conv; width zero-padding is encoded by the band
    limits, so no width padding of the input is needed.
    """
    _, _, Cin, Cout = w_hwio.shape
    wi = jnp.arange(W)[:, None]          # input width index
    wo = jnp.arange(W)[None, :]          # output width index
    kw = wi - wo + 1                     # width tap connecting wi -> wo
    valid = (kw >= 0) & (kw <= 2)
    kw_c = jnp.clip(kw, 0, 2)
    b = w_hwio[:, kw_c, :, :]            # (3, W, W, Cin, Cout): (kh, wi, wo, ci, co)
    b = jnp.where(valid[None, :, :, None, None], b, 0.0)
    b = jnp.transpose(b, (0, 1, 3, 2, 4))          # (kh, wi, ci, wo, co)
    return b.reshape(3, W * Cin, W * Cout)


# ---------------------------------------------------------------------------
# Kernel 1: (optional fused BN-affine+ReLU on the input) -> 3x3 conv + bias,
# plus per-image partial sum / sum-of-squares for BatchNorm batch statistics.
# One batch element per grid step; "parallel" grid axis (no accumulators).
# ---------------------------------------------------------------------------
def _conv_stats_kernel(x_ref, scale_ref, shift_ref, bias_ref, w_ref,
                       h_ref, psum_ref, pssq_ref, xp_ref,
                       *, H, WCin, WCout, fuse_input_act):
    # x_ref:    (1, H, W*Cin)      lane-dense input rows
    # scale/shift_ref: (1, W*Cin)  folded BN affine of the *previous* block
    # bias_ref: (1, W*Cout)        conv bias broadcast over width
    # w_ref:    (3, W*Cin, W*Cout) banded weights (one band per height tap)
    # h_ref:    (1, H, W*Cout)     conv output rows (lane-dense store)
    # psum/pssq_ref: (1, 1, W*Cout) per-image partial statistics
    # xp_ref:   VMEM scratch (H+2, W*Cin) height-halo'd input
    x = x_ref[0]                                            # (H, W*Cin)
    if fuse_input_act:
        # Fused BatchNorm affine + ReLU of the previous block, applied to the
        # freshly loaded tile (saves an extra HBM pass over the intermediate).
        x = jnp.maximum(x * scale_ref[...] + shift_ref[...], 0.0)

    # Height halo built in VMEM (no HBM-side jnp.pad round trip).
    xp_ref[0:1, :] = jnp.zeros((1, WCin), jnp.float32)
    xp_ref[1:H + 1, :] = x
    xp_ref[H + 1:H + 2, :] = jnp.zeros((1, WCin), jnp.float32)

    acc = jnp.zeros((H, WCout), jnp.float32)
    for kh in range(3):                                     # 3 MXU matmuls
        acc = acc + jnp.dot(xp_ref[kh:kh + H, :], w_ref[kh],
                            preferred_element_type=jnp.float32)
    h = acc + bias_ref[...]                                 # (H, W*Cout)

    h_ref[0] = h
    psum_ref[0] = jnp.sum(h, axis=0, keepdims=True)
    pssq_ref[0] = jnp.sum(h * h, axis=0, keepdims=True)


def conv3x3_block(x2d, w_banded, bias_row, scale_row, shift_row,
                  *, H, W, Cin, Cout, fuse_input_act):
    N = x2d.shape[0]
    WCin, WCout = W * Cin, W * Cout
    kernel = functools.partial(_conv_stats_kernel, H=H, WCin=WCin,
                               WCout=WCout, fuse_input_act=fuse_input_act)
    h, ps, pss = pl.pallas_call(
        kernel,
        out_shape=(
            jax.ShapeDtypeStruct((N, H, WCout), jnp.float32),
            jax.ShapeDtypeStruct((N, 1, WCout), jnp.float32),
            jax.ShapeDtypeStruct((N, 1, WCout), jnp.float32),
        ),
        grid_spec=pltpu.PrefetchScalarGridSpec(
            num_scalar_prefetch=0,
            grid=(N,),
            in_specs=[
                pl.BlockSpec((1, H, WCin), lambda n: (n, 0, 0)),
                pl.BlockSpec((1, WCin), lambda n: (0, 0)),
                pl.BlockSpec((1, WCin), lambda n: (0, 0)),
                pl.BlockSpec((1, WCout), lambda n: (0, 0)),
                pl.BlockSpec((3, WCin, WCout), lambda n: (0, 0, 0)),
            ],
            out_specs=[
                pl.BlockSpec((1, H, WCout), lambda n: (n, 0, 0)),
                pl.BlockSpec((1, 1, WCout), lambda n: (n, 0, 0)),
                pl.BlockSpec((1, 1, WCout), lambda n: (n, 0, 0)),
            ],
            scratch_shapes=[pltpu.VMEM((H + 2, WCin), jnp.float32)],
        ),
        compiler_params=pltpu.CompilerParams(
            dimension_semantics=("parallel",)),   # per-image outputs, no races
    )(x2d, scale_row, shift_row, bias_row, w_banded)
    return h, ps, pss


# ---------------------------------------------------------------------------
# Kernel 2: final folded-BN affine + ReLU on a lane-dense 2-D slab.
# ---------------------------------------------------------------------------
def _affine_relu_kernel(h_ref, scale_ref, shift_ref, z_ref):
    z_ref[...] = jnp.maximum(h_ref[...] * scale_ref[...] + shift_ref[...], 0.0)


def affine_relu_2d(h_flat, scale_row, shift_row):
    R, C = h_flat.shape
    # Test shapes are tiny: one full-extent block.
    # TODO(synk): tile rows (multiples of 8) for very large N*H to stay in VMEM.
    return pl.pallas_call(
        _affine_relu_kernel,
        out_shape=jax.ShapeDtypeStruct((R, C), jnp.float32),
        grid_spec=pltpu.PrefetchScalarGridSpec(
            num_scalar_prefetch=0,
            grid=(1,),
            in_specs=[
                pl.BlockSpec((R, C), lambda i: (0, 0)),
                pl.BlockSpec((1, C), lambda i: (0, 0)),
                pl.BlockSpec((1, C), lambda i: (0, 0)),
            ],
            out_specs=pl.BlockSpec((R, C), lambda i: (0, 0)),
        ),
        compiler_params=pltpu.CompilerParams(
            dimension_semantics=("arbitrary",)),
    )(h_flat, scale_row, shift_row)


# ---------------------------------------------------------------------------
# Double33Conv forward (training-mode BatchNorm: batch statistics, biased
# variance, eps=1e-5).
# ---------------------------------------------------------------------------
def double33conv_forward(x_nchw, params, eps=1e-5):
    N, cin, H, W = x_nchw.shape
    # NCHW -> NHWC -> (N, H, W*C); the reshape is free (same memory layout).
    x2d = jnp.transpose(x_nchw, (0, 2, 3, 1)).reshape(N, H, W * cin)

    scale_row = jnp.zeros((1, W * cin), jnp.float32)   # unused for block 1
    shift_row = jnp.zeros((1, W * cin), jnp.float32)
    fuse = False
    for blk in ("1", "2"):
        w, b = params[f"w{blk}"], params[f"b{blk}"]
        gamma, beta = params[f"gamma{blk}"], params[f"beta{blk}"]
        cout = w.shape[-1]

        w_banded = _make_banded_weights(w, W)            # (3, W*cin, W*cout)
        bias_row = jnp.tile(b, W).reshape(1, W * cout)

        h, ps, pss = conv3x3_block(
            x2d, w_banded, bias_row, scale_row, shift_row,
            H=H, W=W, Cin=cin, Cout=cout, fuse_input_act=fuse)

        nhw = N * H * W
        s = ps.reshape(N, W, cout).sum(axis=(0, 1))
        ss = pss.reshape(N, W, cout).sum(axis=(0, 1))
        mean = s / nhw
        var = ss / nhw - mean * mean                     # biased variance (BN)
        scale = gamma * jax.lax.rsqrt(var + eps)
        shift = beta - mean * scale
        # Broadcast per-channel affine over the width-major lane layout.
        scale_row = jnp.tile(scale, W).reshape(1, W * cout)
        shift_row = jnp.tile(shift, W).reshape(1, W * cout)

        x2d = h          # block-1's BN+ReLU is applied inside block-2's conv
        cin = cout
        fuse = True

    # Final block's BN affine + ReLU (lane-dense elementwise pass).
    z = affine_relu_2d(x2d.reshape(N * H, W * cin), scale_row, shift_row)
    z = z.reshape(N, H, W, cin)
    return jnp.transpose(z, (0, 3, 1, 2))                # NHWC -> NCHW


# ---------------------------------------------------------------------------
# Pure-JAX reference (for correctness check).
# ---------------------------------------------------------------------------
def _ref_forward(x_nchw, params, eps=1e-5):
    x = jnp.transpose(x_nchw, (0, 2, 3, 1))
    for blk in ("1", "2"):
        w, b = params[f"w{blk}"], params[f"b{blk}"]
        gamma, beta = params[f"gamma{blk}"], params[f"beta{blk}"]
        h = jax.lax.conv_general_dilated(
            x, w, window_strides=(1, 1), padding="SAME",
            dimension_numbers=("NHWC", "HWIO", "NHWC")) + b
        mean = h.mean(axis=(0, 1, 2))
        var = h.var(axis=(0, 1, 2))   # biased, like PyTorch BN normalization
        x = jnp.maximum((h - mean) / jnp.sqrt(var + eps) * gamma + beta, 0.0)
    return jnp.transpose(x, (0, 3, 1, 2))


if __name__ == "__main__":
    N, Cin, Cout, H, W = 2, 4, 8, 16, 16
    key = jax.random.PRNGKey(0)
    keys = jax.random.split(key, 9)

    x = jax.random.normal(keys[0], (N, Cin, H, W), jnp.float32)

    params = {
        # conv weights stored HWIO (3,3,Cin,Cout) for the NHWC-style kernels
        "w1": 0.1 * jax.random.normal(keys[1], (3, 3, Cin, Cout), jnp.float32),
        "b1": 0.1 * jax.random.normal(keys[2], (Cout,), jnp.float32),
        "gamma1": 1.0 + 0.1 * jax.random.normal(keys[3], (Cout,), jnp.float32),
        "beta1": 0.1 * jax.random.normal(keys[4], (Cout,), jnp.float32),
        "w2": 0.1 * jax.random.normal(keys[5], (3, 3, Cout, Cout), jnp.float32),
        "b2": 0.1 * jax.random.normal(keys[6], (Cout,), jnp.float32),
        "gamma2": 1.0 + 0.1 * jax.random.normal(keys[7], (Cout,), jnp.float32),
        "beta2": 0.1 * jax.random.normal(keys[8], (Cout,), jnp.float32),
    }

    out = jax.block_until_ready(double33conv_forward(x, params))
    ref = jax.block_until_ready(_ref_forward(x, params))

    assert out.shape == (N, Cout, H, W), out.shape
    assert jnp.allclose(out, ref, atol=1e-3, rtol=1e-3), (
        float(jnp.max(jnp.abs(out - ref))))
    print("KERNEL_OK")
</pallas_src>

<mosaic_0001>
module attributes {stable_mosaic.version = 11 : i64} {
  func.func @_conv_stats_kernel(%arg0: i32, %arg1: memref<1x16x64xf32, #tpu.memory_space<vmem>>, %arg2: memref<1x64xf32, #tpu.memory_space<vmem>>, %arg3: memref<1x64xf32, #tpu.memory_space<vmem>>, %arg4: memref<1x128xf32, #tpu.memory_space<vmem>>, %arg5: memref<3x64x128xf32, #tpu.memory_space<vmem>>, %arg6: memref<1x16x128xf32, #tpu.memory_space<vmem>>, %arg7: memref<1x1x128xf32, #tpu.memory_space<vmem>>, %arg8: memref<1x1x128xf32, #tpu.memory_space<vmem>>, %arg9: memref<18x64xf32, #tpu.memory_space<vmem>>) attributes {dimension_semantics = [#tpu.dimension_semantics<parallel>], iteration_bounds = array<i64: 2>, scalar_prefetch = 0 : i64, scratch_operands = 1 : i64, tpu.core_type = #tpu.core_type<tc>, window_params = [{transform_indices = @transform_0, window_bounds = array<i64: 1, 16, 64>}, {pipeline_mode = #tpu.pipeline_mode<synchronous>, transform_indices = @transform_1, window_bounds = array<i64: 1, 64>}, {pipeline_mode = #tpu.pipeline_mode<synchronous>, transform_indices = @transform_2, window_bounds = array<i64: 1, 64>}, {pipeline_mode = #tpu.pipeline_mode<synchronous>, transform_indices = @transform_3, window_bounds = array<i64: 1, 128>}, {pipeline_mode = #tpu.pipeline_mode<synchronous>, transform_indices = @transform_4, window_bounds = array<i64: 3, 64, 128>}, {transform_indices = @transform_5, window_bounds = array<i64: 1, 16, 128>}, {transform_indices = @transform_6, window_bounds = array<i64: 1, 1, 128>}, {transform_indices = @transform_7, window_bounds = array<i64: 1, 1, 128>}]} {
    %c0 = arith.constant 0 : index
    %c0_0 = arith.constant 0 : index
    %c0_1 = arith.constant 0 : index
    %0 = vector.load %arg1[%c0, %c0_0, %c0_1] : memref<1x16x64xf32, #tpu.memory_space<vmem>>, vector<1x16x64xf32>
    %1 = vector.shape_cast %0 : vector<1x16x64xf32> to vector<16x64xf32>
    %cst = arith.constant 0.000000e+00 : f32
    %2 = vector.broadcast %cst : f32 to vector<1x64xf32>
    %c0_2 = arith.constant 0 : index
    %c0_3 = arith.constant 0 : index
    %3 = vector.load %arg9[%c0_2, %c0_3] : memref<18x64xf32, #tpu.memory_space<vmem>>, vector<1x64xf32>
    tpu.vector_store %arg9[%c0_2, %c0_3], %2 {strides = array<i32>} : memref<18x64xf32, #tpu.memory_space<vmem>>, vector<1x64xf32>,
    %c1 = arith.constant 1 : index
    %c0_4 = arith.constant 0 : index
    %4 = vector.load %arg9[%c1, %c0_4] : memref<18x64xf32, #tpu.memory_space<vmem>>, vector<16x64xf32>
    tpu.vector_store %arg9[%c1, %c0_4], %1 {strides = array<i32>} : memref<18x64xf32, #tpu.memory_space<vmem>>, vector<16x64xf32>,
    %cst_5 = arith.constant 0.000000e+00 : f32
    %5 = vector.broadcast %cst_5 : f32 to vector<1x64xf32>
    %c17 = arith.constant 17 : index
    %c0_6 = arith.constant 0 : index
    %6 = vector.load %arg9[%c17, %c0_6] : memref<18x64xf32, #tpu.memory_space<vmem>>, vector<1x64xf32>
    tpu.vector_store %arg9[%c17, %c0_6], %5 {strides = array<i32>} : memref<18x64xf32, #tpu.memory_space<vmem>>, vector<1x64xf32>,
    %cst_7 = arith.constant 0.000000e+00 : f32
    %7 = vector.broadcast %cst_7 : f32 to vector<16x128xf32>
    %c0_8 = arith.constant 0 : index
    %c0_9 = arith.constant 0 : index
    %8 = vector.load %arg9[%c0_8, %c0_9] : memref<18x64xf32, #tpu.memory_space<vmem>>, vector<16x64xf32>
    %c0_10 = arith.constant 0 : index
    %c0_11 = arith.constant 0 : index
    %c0_12 = arith.constant 0 : index
    %9 = vector.load %arg5[%c0_10, %c0_11, %c0_12] : memref<3x64x128xf32, #tpu.memory_space<vmem>>, vector<1x64x128xf32>
    %10 = vector.shape_cast %9 : vector<1x64x128xf32> to vector<64x128xf32>
    %cst_13 = arith.constant dense<0.000000e+00> : vector<16x128xf32>
    %11 = tpu.matmul %8, %10, %cst_13 {dimension_numbers = #tpu.dot_dimension_numbers<[1], [0], [0], [1], [0, 0, 1, 1], [], []>} : vector<16x64xf32>, vector<64x128xf32>, vector<16x128xf32> -> vector<16x128xf32>
    %12 = arith.addf %7, %11 : vector<16x128xf32>
    %c1_14 = arith.constant 1 : index
    %c0_15 = arith.constant 0 : index
    %13 = vector.load %arg9[%c1_14, %c0_15] : memref<18x64xf32, #tpu.memory_space<vmem>>, vector<16x64xf32>
    %c1_16 = arith.constant 1 : index
    %c0_17 = arith.constant 0 : index
    %c0_18 = arith.constant 0 : index
    %14 = vector.load %arg5[%c1_16, %c0_17, %c0_18] : memref<3x64x128xf32, #tpu.memory_space<vmem>>, vector<1x64x128xf32>
    %15 = vector.shape_cast %14 : vector<1x64x128xf32> to vector<64x128xf32>
    %cst_19 = arith.constant dense<0.000000e+00> : vector<16x128xf32>
    %16 = tpu.matmul %13, %15, %cst_19 {dimension_numbers = #tpu.dot_dimension_numbers<[1], [0], [0], [1], [0, 0, 1, 1], [], []>} : vector<16x64xf32>, vector<64x128xf32>, vector<16x128xf32> -> vector<16x128xf32>
    %17 = arith.addf %12, %16 : vector<16x128xf32>
    %c2 = arith.constant 2 : index
    %c0_20 = arith.constant 0 : index
    %18 = vector.load %arg9[%c2, %c0_20] : memref<18x64xf32, #tpu.memory_space<vmem>>, vector<16x64xf32>
    %c2_21 = arith.constant 2 : index
    %c0_22 = arith.constant 0 : index
    %c0_23 = arith.constant 0 : index
    %19 = vector.load %arg5[%c2_21, %c0_22, %c0_23] : memref<3x64x128xf32, #tpu.memory_space<vmem>>, vector<1x64x128xf32>
    %20 = vector.shape_cast %19 : vector<1x64x128xf32> to vector<64x128xf32>
    %cst_24 = arith.constant dense<0.000000e+00> : vector<16x128xf32>
    %21 = tpu.matmul %18, %20, %cst_24 {dimension_numbers = #tpu.dot_dimension_numbers<[1], [0], [0], [1], [0, 0, 1, 1], [], []>} : vector<16x64xf32>, vector<64x128xf32>, vector<16x128xf32> -> vector<16x128xf32>
    %22 = arith.addf %17, %21 : vector<16x128xf32>
    %c0_25 = arith.constant 0 : index
    %c0_26 = arith.constant 0 : index
    %23 = vector.load %arg4[%c0_25, %c0_26] : memref<1x128xf32, #tpu.memory_space<vmem>>, vector<1x128xf32>
    %24 = vector.broadcast %23 : vector<1x128xf32> to vector<16x128xf32>
    %25 = arith.addf %22, %24 : vector<16x128xf32>
    %c0_27 = arith.constant 0 : index
    %c0_28 = arith.constant 0 : index
    %c0_29 = arith.constant 0 : index
    %26 = vector.load %arg6[%c0_27, %c0_28, %c0_29] : memref<1x16x128xf32, #tpu.memory_space<vmem>>, vector<1x16x128xf32>
    %27 = vector.shape_cast %26 : vector<1x16x128xf32> to vector<16x128xf32>
    %28 = vector.shape_cast %25 : vector<16x128xf32> to vector<1x16x128xf32>
    tpu.vector_store %arg6[%c0_27, %c0_28, %c0_29], %28 {strides = array<i32>} : memref<1x16x128xf32, #tpu.memory_space<vmem>>, vector<1x16x128xf32>,
    %cst_30 = arith.constant dense<0.000000e+00> : vector<128xf32>
    %29 = vector.multi_reduction <add>, %25, %cst_30 [0] : vector<16x128xf32> to vector<128xf32>
    %30 = vector.shape_cast %29 : vector<128xf32> to vector<1x128xf32>
    %c0_31 = arith.constant 0 : index
    %c0_32 = arith.constant 0 : index
    %c0_33 = arith.constant 0 : index
    %31 = vector.load %arg7[%c0_31, %c0_32, %c0_33] : memref<1x1x128xf32, #tpu.memory_space<vmem>>, vector<1x1x128xf32>
    %32 = vector.shape_cast %31 : vector<1x1x128xf32> to vector<1x128xf32>
    %33 = vector.shape_cast %30 : vector<1x128xf32> to vector<1x1x128xf32>
    tpu.vector_store %arg7[%c0_31, %c0_32, %c0_33], %33 {strides = array<i32>} : memref<1x1x128xf32, #tpu.memory_space<vmem>>, vector<1x1x128xf32>,
    %34 = arith.mulf %25, %25 : vector<16x128xf32>
    %cst_34 = arith.constant dense<0.000000e+00> : vector<128xf32>
    %35 = vector.multi_reduction <add>, %34, %cst_34 [0] : vector<16x128xf32> to vector<128xf32>
    %36 = vector.shape_cast %35 : vector<128xf32> to vector<1x128xf32>
    %c0_35 = arith.constant 0 : index
    %c0_36 = arith.constant 0 : index
    %c0_37 = arith.constant 0 : index
    %37 = vector.load %arg8[%c0_35, %c0_36, %c0_37] : memref<1x1x128xf32, #tpu.memory_space<vmem>>, vector<1x1x128xf32>
    %38 = vector.shape_cast %37 : vector<1x1x128xf32> to vector<1x128xf32>
    %39 = vector.shape_cast %36 : vector<1x128xf32> to vector<1x1x128xf32>
    tpu.vector_store %arg8[%c0_35, %c0_36, %c0_37], %39 {strides = array<i32>} : memref<1x1x128xf32, #tpu.memory_space<vmem>>, vector<1x1x128xf32>,
    return
  }
  func.func @transform_0(%arg0: i32) -> (i32, i32, i32) {
    %c0_i32 = arith.constant 0 : i32
    %c0_i32_0 = arith.constant 0 : i32
    %c0_i32_1 = arith.constant 0 : i32
    return %arg0, %c0_i32, %c0_i32_0 : i32, i32, i32
  }
  func.func @transform_1(%arg0: i32) -> (i32, i32) {
    %c0_i32 = arith.constant 0 : i32
    %c0_i32_0 = arith.constant 0 : i32
    %c0_i32_1 = arith.constant 0 : i32
    return %c0_i32, %c0_i32_0 : i32, i32
  }
  func.func @transform_2(%arg0: i32) -> (i32, i32) {
    %c0_i32 = arith.constant 0 : i32
    %c0_i32_0 = arith.constant 0 : i32
    %c0_i32_1 = arith.constant 0 : i32
    return %c0_i32, %c0_i32_0 : i32, i32
  }
  func.func @transform_3(%arg0: i32) -> (i32, i32) {
    %c0_i32 = arith.constant 0 : i32
    %c0_i32_0 = arith.constant 0 : i32
    %c0_i32_1 = arith.constant 0 : i32
    return %c0_i32, %c0_i32_0 : i32, i32
  }
  func.func @transform_4(%arg0: i32) -> (i32, i32, i32) {
    %c0_i32 = arith.constant 0 : i32
    %c0_i32_0 = arith.constant 0 : i32
    %c0_i32_1 = arith.constant 0 : i32
    %c0_i32_2 = arith.constant 0 : i32
    return %c0_i32, %c0_i32_0, %c0_i32_1 : i32, i32, i32
  }
  func.func @transform_5(%arg0: i32) -> (i32, i32, i32) {
    %c0_i32 = arith.constant 0 : i32
    %c0_i32_0 = arith.constant 0 : i32
    %c0_i32_1 = arith.constant 0 : i32
    return %arg0, %c0_i32, %c0_i32_0 : i32, i32, i32
  }
  func.func @transform_6(%arg0: i32) -> (i32, i32, i32) {
    %c0_i32 = arith.constant 0 : i32
    %c0_i32_0 = arith.constant 0 : i32
    %c0_i32_1 = arith.constant 0 : i32
    return %arg0, %c0_i32, %c0_i32_0 : i32, i32, i32
  }
  func.func @transform_7(%arg0: i32) -> (i32, i32, i32) {
    %c0_i32 = arith.constant 0 : i32
    %c0_i32_0 = arith.constant 0 : i32
    %c0_i32_1 = arith.constant 0 : i32
    return %arg0, %c0_i32, %c0_i32_0 : i32, i32, i32
  }
}

</mosaic_0001>

<bundles_post_ra>
// kernel: tpu_custom_call.1
= control target key start
LH: loop header
LB: loop body
LE: loop exit
PB: predicated region body
PF: predicated region fallthrough
CT: control target
= control target key end

     0   :  { %13 = vsyncpa [#allocation4], 0  ;;  %s1598_s0 = inlined_call_operand.hbm [shape: f32[2,16,64], index: 0, kind: input, shape index: {}]   ;;  %s1599_s1 = inlined_call_operand.vmem [shape: f32[1,64], index: 1, kind: input, shape index: {}]   ;;  %s1600_s2 = inlined_call_operand.vmem [shape: f32[1,64], index: 2, kind: input, shape index: {}]   ;;  %s1601_s3 = inlined_call_operand.vmem [shape: f32[1,128], index: 3, kind: input, shape index: {}]   ;;  %s1602_s4 = inlined_call_operand.hbm [shape: f32[3,64,128], index: 4, kind: input, shape index: {}]   ;;  %s1603_s5 = inlined_call_operand.hbm [shape: f32[2,16,128], index: 5, kind: output, shape index: {0}]   ;;  %s1604_s6 = inlined_call_operand.hbm [shape: f32[2,1,128], index: 6, kind: output, shape index: {1}]   ;;  %s1605_s7 = inlined_call_operand.hbm [shape: f32[2,1,128], index: 7, kind: output, shape index: {2}]  }
   0x1   :  { %15 = vsyncpa [#allocation4 + $0x1], 0 }
   0x2   :  { %16 = vsyncpa [#allocation7], 0 }
   0x3   :  { %17 = vsyncpa [#allocation5], 0 }
   0x4   :  { %19 = vsyncpa [#allocation5 + $0x1], 0 }
   0x5   :  { %20 = vsyncpa [#allocation10], 0 }
   0x6   :  { %22 = vsyncpa [#allocation10 + $0x1], 0  ;;  %s1304_s1 = smov 0   ;;  %s1306_s2 = smov 0  }
   0x7   :  { %s1308_s24 = smov 0   ;;  %s1310_s25 = smov 0  }
   0x8 LB: > { %s1325_s26 = sadd.s32 4294967295, %s1252_s25   ;;  %s826_s27 = sadd.s32 4294967294, %s1252_s25   ;;  %s1252_s25 = sphi %s1310_s25, %s1625_s25   ;;  %s1248_s24 = sphi %s1308_s24, %s1624_s24   ;;  %s1244_s2 = sphi %s1306_s2, %s1623_s2   ;;  %s1240_s1 = sphi %s1304_s1, %s1622_s1  }
   0x9   : > { %p48_p0 = scmp.ne.s32.totalorder %s1244_s2, %s1240_s1  ;;  %p1606_p1 = scmp.eq.s32.totalorder %s1325_s26, 0 }
   0xa   : > { %p162_p3 = scmp.eq.s32.totalorder %s826_s27, 1  ;;  %p827_p5 = scmp.ge.s32.totalorder %s1252_s25, 1 }
   0xb   : > { %p1336_p4 = por %p1606_p1, %p48_p0  ;;  %p221_p7 = scmp.lt.s32.totalorder %s1252_s25, 3 }
   0xc   : > { %p1341_p6 = por %p162_p3, %p48_p0  ;;  %s1254_s8 = smov [#allocation6]  }
   0xd   : > { %s1609_s28 = scalar_select %p1336_p4, 1, 0 }
   0xe   : > { %s1610_s29 = scalar_select %p1341_p6, 1, 0 }
   0xf   : > { %p1346_p8 = pnand %p827_p5, %p221_p7  ;;  %s242_s9 = sshll.u32 %s1254_s8, 4  ;;  %s1350_s9 = int_to_ptr.vmem [resolvable:$true] %s242_s9 }
  0x10   : > { %s1362_s11 = sadd.s32 1, %s1252_s25   ;;  %s35_s12 = sadd.s32 1, %s1248_s24 }
  0x11   : > { %s1611_s30 = scalar_select %p1346_p8, 1, 0 }
  0x12   : > { %p1004_p9 = pneg %p1346_p8  ;;  %s32_s13 = ssub.s32 %s1252_s25, %s1362_s11 }
  0x13   : > { %s1064_s16 = scalar_lea.hbm %s1602_s4, 3072 }
  0x14   : > { %p1357_p11 = pnand %p1004_p9, %p1606_p1  ;;  %p1065_p12 = scmp.ne.s32.totalorder %s1602_s4, %s1064_s16 }
  0x15   : > { %p1071_p5 = scmp.lt.u32.totalorder %s1064_s16, %s1602_s4 }
  0x16   : > { %p1066_p13 = pneg %p1357_p11 }
  0x18   : > { %p1067_p0 = pnand %p1066_p13, %p1065_p12 }
  0x1a   : > { %p1068_p3 = pneg %p1067_p0 }
  0x1c   : > { %p1073_p7 = pnand %p1071_p5, %p1068_p3 }
  0x1e   : > { %1076 = shalt.err (!%p1073_p7)
}
  0x1f   : > { %s1077_s21 = scalar_lea.vmem %s1350_s9, 3072  ;;  %p1085_p2 = scmp.lt.s32.totalorder %s1350_s9, %s1350_s9 }
  0x20   : > { %p1078_p9 = scmp.ne.s32.totalorder %s1350_s9, %s1077_s21  ;;  %p1086_p6 = scmp.lt.s32.totalorder %s1077_s21, %s1077_s21 }
  0x22   : > { %p1080_p10 = pnand %p1078_p9, %p1066_p13  ;;  %p1087_p4 = por %p1086_p6, %p1085_p2 }
  0x24   : > { %p1081_p1 = pneg %p1080_p10 }
  0x26   : > { %p1088_p8 = pnand %p1087_p4, %p1081_p1 }
  0x28   : > { %1091 = shalt.err (!%p1088_p8)
}
  0x29   : > { %s1255_s22 = smov 128   ;;  %s1256_s23 = smov 8  }
  0x2a   : > { %1007 = dma.hbm_to_vmem [thread:$0]  (!%p1357_p11), %s1602_s4, 3072, %s1350_s9, [#allocation7], %s1255_s22, %s1255_s22, %s1256_s23  }
  0x2b   : > { %p33_p1 = scmp.eq.s32.totalorder %s32_s13, 0  ;;  %p42_p2 = scmp.ne.s32.totalorder %s1248_s24, %s1244_s2 }
  0x2c   : > { %p43_p4 = scmp.eq.s32.totalorder %s1252_s25, 0  ;;  %p1023_p6 = scmp.lt.s32.totalorder %s1252_s25, 2 }
  0x2d   : > { %s1396_s15 = scalar_select %p33_p1, %s1248_s24, %s35_s12  }
  0x2e   : > { %p44_p8 = por %p43_p4, %p42_p2  ;;  %p1613_p10 = scmp.eq.s32.totalorder %s1325_s26, 1 }
  0x2f   : > { %s256_s10 = sand.u32 1, %s1248_s24   ;;  %s851_s17 = sshll.u32 %s1252_s25, 8 }
  0x30   : > { %p1400_p12 = por %p1613_p10, %p42_p2  ;;  %s830_s18 = sshll.u32 %s256_s10, 4 }
  0x31   : > { %s1409_s21 = scalar_lea.hbm %s1598_s0, %s851_s17  ;;  %s260_s9 = scalar_lea.vmem [#allocation3], %s830_s18 }
  0x32   : > { %s267_s12 = sshll.u32 %s260_s9, 4  ;;  %p1411_p11 = pnand %p1023_p6, %p44_p8  ;;  %s1415_s12 = int_to_ptr.vmem [resolvable:$true] %s267_s12 }
  0x33   : > { %s1417_s8 = scalar_lea.sflag [#allocation4], %s256_s10  ;;  %s1092_s14 = scalar_lea.hbm %s1409_s21, 256 }
  0x34   : > { %p1093_p13 = scmp.ne.s32.totalorder %s1409_s21, %s1092_s14  ;;  %p1094_p0 = pneg %p1411_p11 }
  0x35   : > { %s1097_s19 = scalar_lea.hbm %s1598_s0, 512  ;;  %p1098_p7 = scmp.lt.u32.totalorder %s1409_s21, %s1598_s0 }
  0x36   : > { %p1095_p3 = pnand %p1094_p0, %p1093_p13  ;;  %p1099_p9 = scmp.lt.u32.totalorder %s1097_s19, %s1092_s14 }
  0x37   : > { %p1101_p2 = scmp.lt.u32.totalorder %s1092_s14, %s1409_s21 }
  0x38   : > { %p1096_p5 = pneg %p1095_p3  ;;  %p1100_p1 = por %p1099_p9, %p1098_p7 }
  0x3a   : > { %p1102_p4 = por %p1101_p2, %p1100_p1 }
  0x3c   : > { %p1103_p6 = pnand %p1102_p4, %p1096_p5 }
  0x3e   : > { %1106 = shalt.err (!%p1103_p6)
}
  0x3f   : > { %s1107_s10 = scalar_lea.vmem %s1415_s12, 256  ;;  %s1257_s17 = smov [#allocation3]  }
  0x40   : > { %p1108_p8 = scmp.ne.s32.totalorder %s1415_s12, %s1107_s10  ;;  %s1112_s18 = sshll.u32 %s1257_s17, 4  ;;  %s1113_s18 = int_to_ptr.vmem [resolvable:$false] %s1112_s18 }
  0x41   : > { %s1114_s20 = scalar_lea.vmem %s1113_s18, 512  ;;  %p1115_p3 = scmp.lt.s32.totalorder %s1415_s12, %s1113_s18 }
  0x42   : > { %p1110_p10 = pnand %p1108_p8, %p1094_p0  ;;  %p1116_p7 = scmp.lt.s32.totalorder %s1114_s20, %s1107_s10 }
  0x44   : > { %p1111_p13 = pneg %p1110_p10  ;;  %p1117_p9 = por %p1116_p7, %p1115_p3 }
  0x46   : > { %p1118_p1 = pnand %p1117_p9, %p1111_p13 }
  0x48   : > { %1121 = shalt.err (!%p1118_p1)
}
  0x49   : > { %1011 = dma.hbm_to_vmem [thread:$0]  (!%p1411_p11), %s1409_s21, 256, %s1415_s12, %s1417_s8, %s1255_s22, %s1255_s22, %s1256_s23  }
  0x4a   : > { %p1616_p0 = scmp.ne.s32.totalorder %s1611_s30, 0 }
  0x4b   : > { %s1451_s14 = sand.u32 (!%p1616_p0), 1, %s1244_s2   ;;  %p1617_p5 = scmp.ne.s32.totalorder (!%p1616_p0), %s1609_s28, 0 }
  0x4c   : > { %279 = sbr.rel (%p1616_p0) target bundleno = 403 (0x193), region = 40  ;;  %s834_s19 = sshll.u32 (!%p1616_p0), %s1451_s14, 4 }
  0x4d   : > { %s282_s9 = scalar_lea.sflag (!%p1616_p0), [#allocation4], %s1451_s14  ;;  %s285_s13 = scalar_lea.vmem (!%p1616_p0), [#allocation3], %s834_s19 }
  0x53   : > { %1223 = dma.done.wait (%p1617_p5), %s282_s9, 256  }
  0x54   : > { %1225 = vsyncadd (%p1617_p5), %s282_s9, 4294967040  ;;  %p1618_p11 = scmp.eq.s32.totalorder %s1325_s26, 0 }
  0x56   : > { %1227 = dma.done.wait (%p1618_p11), [#allocation7], 3072   ;;  %p1619_p2 = pmov %p1618_p11 }
  0x57   : > { %vm330_vm0 = vcmask 516096   ;;  %v1258_v0 = vmov 0.0   ;;  %v338_v1 = vld [vmem:[#allocation6] sm:$0xff]  ;;  %v339_v2 = vld [vmem:[#allocation6 + $0x8] sm:$0xff]  ;;  %v340_v3 = vld [vmem:[#allocation6 + $0x10] sm:$0xff]  ;;  %vm332_vm1 = vcmask 523264  }
  0x58   : > { %1229 = vsyncadd (%p1619_p2), [#allocation7], 4294964224  ;;  %331 = vst.msk [vmem:[#allocation2] sm:$0x1] %vm330_vm0, %v1258_v0  ;;  %v956_v4 = vpack.c.bf16 %v339_v2, %v338_v1  ;;  %v341_v5 = vld [vmem:[#allocation6 + $0x18] sm:$0xff]  ;;  %v342_v7 = vld [vmem:[#allocation6 + $0x20] sm:$0xff] }
  0x59   : > { %335 = vst.msk [vmem:[#allocation2 + $0x11] sm:$0x1] %vm330_vm0, %v1258_v0  ;;  %v960_v6 = vpack.c.bf16 %v341_v5, %v340_v3  ;;  %v343_v8 = vld [vmem:[#allocation6 + $0x28] sm:$0xff]  ;;  %v349_v9 = vld [vmem:[#allocation6 + $0x40] sm:$0xff]  ;;  %v351_v14 = vld [vmem:[#allocation6 + $0x50] sm:$0xff]  ;;  %s315_s28 = scalar_lea.vmem [#allocation8], %s834_s19 }
  0x5a   : > { %957 = vmatprep.subr.bf16.mxu0 %v956_v4  ;;  %v350_v10 = vld [vmem:[#allocation6 + $0x48] sm:$0xff]  ;;  %v328_v11 = vld [vmem:[%s285_s13] sm:$0xff]  ;;  %v964_v15 = vpack.c.bf16 %v343_v8, %v342_v7  ;;  %v352_v17 = vld [vmem:[#allocation6 + $0x58] sm:$0xff]  ;;  %s664_s30 = sshll.u32 %s315_s28, 4  ;;  %s852_s21 = sshll.u32 %s1325_s26, 8  ;;  %s1479_s30 = int_to_ptr.vmem [resolvable:$true] %s664_s30 }
  0x5b   : > { %v329_v12 = vld [vmem:[%s285_s13 + $0x8] sm:$0xff]  ;;  %959 = vmatpush3.bf16.msra.mxu0 %v956_v4  ;;  %v940_v13 = vpack.c.bf16 %v350_v10, %v349_v9  ;;  %333 = vst.msk [vmem:[#allocation2 + $0x1] sm:$0xff] %vm332_vm1, %v328_v11  ;;  %v344_v16 = vld [vmem:[#allocation6 + $0x30] sm:$0xff]  ;;  %v944_v19 = vpack.c.bf16 %v352_v17, %v351_v14  ;;  %v353_v20 = vld [vmem:[#allocation6 + $0x60] sm:$0xff]  ;;  %s1484_s10 = scalar_lea.hbm %s1603_s5, %s852_s21  ;;  %s643_s17 = scalar_lea.sflag [#allocation5], %s1451_s14 }
  0x5c   : > { %334 = vst.msk [vmem:[#allocation2 + $0x9] sm:$0xff] %vm332_vm1, %v329_v12  ;;  %961 = vmatprep.subr.bf16.mxu0 %v960_v6  ;;  %v345_v18 = vld [vmem:[#allocation6 + $0x38] sm:$0xff]  ;;  %v354_v21 = vld [vmem:[#allocation6 + $0x68] sm:$0xff]  ;;  %v355_v24 = vld [vmem:[#allocation6 + $0x70] sm:$0xff]  ;;  %s1122_s18 = scalar_lea.vmem %s1479_s30, 256  ;;  %s1259_s20 = smov [#allocation8]  }
  0x5d   : > { %941 = vmatprep.subr.bf16.mxu1 %v940_v13  ;;  %v968_v22 = vpack.c.bf16 %v345_v18, %v344_v16  ;;  %v948_v23 = vpack.c.bf16 %v354_v21, %v353_v20  ;;  %v356_v25 = vld [vmem:[#allocation6 + $0x78] sm:$0xff]  ;;  %v522_v26 = vld [vmem:[#allocation6 + $0x80] sm:$0xff]  ;;  %v523_v27 = vld [vmem:[#allocation6 + $0x88] sm:$0xff]  ;;  %p1123_p4 = scmp.ne.s32.totalorder %s1479_s30, %s1122_s18  ;;  %s1126_s19 = sshll.u32 %s1259_s20, 4  ;;  %s1127_s19 = int_to_ptr.vmem [resolvable:$false] %s1126_s19 }
  0x5e   : > { %943 = vmatpush3.bf16.msra.mxu1 %v940_v13  ;;  %v952_v30 = vpack.c.bf16 %v356_v25, %v355_v24  ;;  %v972_v31 = vpack.c.bf16 %v523_v27, %v522_v26  ;;  %v524_v32 = vld [vmem:[#allocation6 + $0x90] sm:$0xff]  ;;  %v525_v33 = vld [vmem:[#allocation6 + $0x98] sm:$0xff]  ;;  %v526_v37 = vld [vmem:[#allocation6 + $0xa0] sm:$0xff]  ;;  %s1128_s9 = scalar_lea.vmem %s1127_s19, 512  ;;  %p1129_p10 = scmp.lt.s32.totalorder %s1479_s30, %s1127_s19 }
  0x5f   : > { %963 = vmatpush3.bf16.msra.mxu0 %v960_v6  ;;  %945 = vmatprep.subr.bf16.mxu1 %v944_v19  ;;  %v976_v35 = vpack.c.bf16 %v525_v33, %v524_v32  ;;  %v527_v38 = vld [vmem:[#allocation6 + $0xa8] sm:$0xff]  ;;  %v528_v41 = vld [vmem:[#allocation6 + $0xb0] sm:$0xff]  ;;  %v529_v42 = vld [vmem:[#allocation6 + $0xb8] sm:$0xff]  ;;  %p1124_p6 = pnand %p1123_p4, %p1400_p12  ;;  %p1130_p13 = scmp.lt.s32.totalorder %s1128_s9, %s1122_s18 }
  0x60   : > { %965 = vmatprep.subr.bf16.mxu0 %v964_v15  ;;  %v980_v40 = vpack.c.bf16 %v527_v38, %v526_v37  ;;  %v984_v43 = vpack.c.bf16 %v529_v42, %v528_v41  ;;  %v843_v48 = vld [vmem:[%s1601_s3] ss:$0 sm:$0xff] }
  0x61   : > { %p1125_p8 = pneg %p1124_p6  ;;  %p1131_p3 = por %p1130_p13, %p1129_p10 }
  0x62   : > { %v336_v28 = vld [vmem:[#allocation2] sm:$0xff]  ;;  %947 = vmatpush3.bf16.msra.mxu1 %v944_v19 }
  0x63   : > { %v346_v29 = vld [vmem:[#allocation2 + $0x1] sm:$0xff]  ;;  %967 = vmatpush3.bf16.msra.mxu0 %v964_v15  ;;  %918 = vmatprep.mubr.msk.f32.mxu0 %vm332_vm1, %v336_v28  ;;  %v347_v39 = vld [vmem:[#allocation2 + $0x9] sm:$0xff]  ;;  %p1132_p7 = pnand %p1131_p3, %p1125_p8 }
  0x64   : > { %969 = vmatprep.subr.bf16.mxu0 %v968_v22  ;;  %949 = vmatprep.subr.bf16.mxu1 %v948_v23  ;;  %v337_v34 = vld [vmem:[#allocation2 + $0x8] sm:$0xff] }
  0x65   : > { %899 = vmatprep.mubr.msk.f32.mxu1 %vm332_vm1, %v346_v29  ;;  %v519_v36 = vld [vmem:[#allocation2 + $0x2] sm:$0xff]  ;;  %v520_v44 = vld [vmem:[#allocation2 + $0xa] sm:$0xff] }
  0x66   : > { %951 = vmatpush3.bf16.msra.mxu1 %v948_v23 }
  0x67   : > { %971 = vmatpush3.bf16.msra.mxu0 %v968_v22  ;;  %953 = vmatprep.subr.bf16.mxu1 %v952_v30 }
  0x68   : > { %973 = vmatprep.subr.bf16.mxu0 %v972_v31 }
  0x6a   : > { %919 = vmatmul.mubr.msk.f32.vlgmr.msra.gmra.mrb[0].mxu0 %vm332_vm1, %v337_v34  ;;  %955 = vmatpush3.bf16.msra.mxu1 %v952_v30 }
  0x6b   : > { %975 = vmatpush3.bf16.msra.mxu0 %v972_v31  ;;  %937 = vmatprep.mubr.msk.f32.mxu0 %vm332_vm1, %v519_v36 }
  0x6c   : > { %977 = vmatprep.subr.bf16.mxu0 %v976_v35 }
  0x6d   : > { %900 = vmatmul.mubr.msk.f32.vlgmr.msra.gmra.mrb[0].mxu1 %vm332_vm1, %v347_v39 }
  0x6f   : > { %979 = vmatpush3.bf16.msra.mxu0 %v976_v35 }
  0x70   : > { %981 = vmatprep.subr.bf16.mxu0 %v980_v40 }
  0x73   : > { %983 = vmatpush3.bf16.msra.mxu0 %v980_v40 }
  0x74   : > { %985 = vmatprep.subr.bf16.mxu0 %v984_v43 }
  0x77   : > { %987 = vmatpush3.bf16.msra.mxu0 %v984_v43 }
  0x7a   : > { %938 = vmatmul.mubr.msk.f32.vlgmr.msra.gmra.mrb[0].mxu0 %vm332_vm1, %v520_v44 }
 0x140   : > { %v901_v45 = vpop.f32.mrb[0].mxu1 }
 0x141   : > { %v429_v46 = vpop.f32.mrb[1].mxu1 }
 0x14d   : > { %v939_v47 = vpop.f32.mrb[0].mxu0 }
 0x14e   : > { %v988_v49 = vadd.f32 %v939_v47, %v901_v45  ;;  %v602_v50 = vpop.f32.mrb[1].mxu0 }
 0x14f   : > { %v989_v51 = vadd.f32 %v602_v50, %v429_v46 }
 0x150   : > { %v621_v52 = vadd.f32 %v988_v49, %v843_v48 }
 0x151   : > { %v620_v53 = vadd.f32 %v989_v51, %v843_v48 }
 0x152   : > { %623 = vst [vmem:[%s315_s28 + $0x8] sm:$0xff] %v621_v52  ;;  %v633_v54 = vmul.f32 %v621_v52, %v621_v52 }
 0x153   : > { %622 = vst [vmem:[%s315_s28] sm:$0xff] %v620_v53  ;;  %v624_v55 = vadd.f32 %v621_v52, %v620_v53  ;;  %v632_v56 = vmul.f32 %v620_v53, %v620_v53 }
 0x154   : > { %1135 = shalt.err (!%p1132_p7)
}
 0x155   : > { %s1136_s13 = scalar_lea.hbm %s1484_s10, 256  ;;  %s1140_s23 = scalar_lea.hbm %s1603_s5, 512 }
 0x156   : > { %p1137_p9 = scmp.ne.s32.totalorder %s1484_s10, %s1136_s13  ;;  %p1141_p5 = scmp.lt.u32.totalorder %s1484_s10, %s1603_s5 }
 0x157   : > { %p1142_p11 = scmp.lt.u32.totalorder %s1140_s23, %s1136_s13  ;;  %p1144_p4 = scmp.lt.u32.totalorder %s1136_s13, %s1484_s10 }
 0x158   : > { %p1138_p1 = pnand %p1137_p9, %p1400_p12 }
 0x159   : > { %p1143_p2 = por %p1142_p11, %p1141_p5 }
 0x15a   : > { %p1139_p0 = pneg %p1138_p1 }
 0x15b   : > { %p1145_p6 = por %p1144_p4, %p1143_p2 }
 0x15d   : > { %p1146_p8 = pnand %p1145_p6, %p1139_p0 }
 0x15f   : > { %1149 = shalt.err (!%p1146_p8)
}
 0x160   : > { %s1260_s8 = smov 128   ;;  %s1261_s18 = smov 8   ;;  %v625_v57 = vrot.slane %v624_v55, 4  ;;  %v634_v58 = vadd.f32 %v633_v54, %v632_v56 }
 0x161   : > { %998 = dma.vmem_to_hbm [thread:$0]  (%p1400_p12), %s1479_s30, 256, %s1484_s10, %s643_s17, %s1260_s8, %s1260_s8, %s1261_s18  }
 0x162   : > { %v626_v59 = vadd.f32 %v625_v57, %v624_v55  ;;  %v635_v60 = vrot.slane %v634_v58, 4  ;;  %s647_s20 = sand.u32 1, %s1325_s26   ;;  %s847_s19 = sshll.u32 %s1325_s26, 4 }
 0x163   : > { %s321_s9 = scalar_lea.vmem [#allocation9], %s1451_s14  ;;  %s327_s28 = scalar_lea.vmem [#allocation11], %s1451_s14 }
 0x164   : > { %v627_v61 = vrot.slane %v626_v59, 2  ;;  %v636_v62 = vadd.f32 %v635_v60, %v634_v58  ;;  %s680_s13 = sshll.u32 %s321_s9, 4  ;;  %s693_s22 = sshll.u32 %s327_s28, 4  ;;  %s1521_s13 = int_to_ptr.vmem [resolvable:$true] %s680_s13  ;;  %s1528_s22 = int_to_ptr.vmem [resolvable:$true] %s693_s22 }
 0x165   : > { %s1519_s17 = scalar_lea.hbm %s1604_s6, %s847_s19  ;;  %s1526_s21 = scalar_lea.hbm %s1605_s7, %s847_s19 }
 0x166   : > { %v628_v63 = vadd.f32 %v627_v61, %v626_v59  ;;  %v637_v0 = vrot.slane %v636_v62, 2  ;;  %s1530_s12 = scalar_lea.sflag [#allocation10], %s647_s20  ;;  %s1150_s8 = scalar_lea.vmem %s1521_s13, 16 }
 0x167   : > { %p1151_p10 = scmp.ne.s32.totalorder %s1521_s13, %s1150_s8  ;;  %s1262_s18 = smov [#allocation9]  }
 0x168   : > { %v638_v1 = vadd.f32 %v637_v0, %v636_v62  ;;  %v629_v2 = vrot.slane %v628_v63, 1  ;;  %s1154_s30 = sshll.u32 %s1262_s18, 4  ;;  %s1155_s30 = int_to_ptr.vmem [resolvable:$false] %s1154_s30 }
 0x169   : > { %p1152_p13 = pnand %p1151_p10, %p1400_p12  ;;  %s1156_s10 = scalar_lea.vmem %s1155_s30, 32 }
 0x16a   : > { %v630_v3 = vadd.f32 %v629_v2, %v628_v63  ;;  %v639_v4 = vrot.slane %v638_v1, 1  ;;  %p1157_p7 = scmp.lt.s32.totalorder %s1521_s13, %s1155_s30  ;;  %p1158_p9 = scmp.lt.s32.totalorder %s1156_s10, %s1150_s8 }
 0x16b   : > { %p1153_p3 = pneg %p1152_p13 }
 0x16c   : > { %631 = vst [vmem:[%s321_s9] sm:$0x1] %v630_v3  ;;  %v640_v5 = vadd.f32 %v639_v4, %v638_v1  ;;  %p1159_p1 = por %p1158_p9, %p1157_p7 }
 0x16e   : > { %p1160_p0 = pnand %p1159_p1, %p1153_p3 }
 0x170   : > { %1163 = shalt.err (!%p1160_p0)
}
 0x171   : > { %s1164_s20 = scalar_lea.hbm %s1519_s17, 16  ;;  %s1168_s26 = scalar_lea.hbm %s1604_s6, 32 }
 0x172   : > { %p1165_p5 = scmp.ne.s32.totalorder %s1519_s17, %s1164_s20  ;;  %p1169_p4 = scmp.lt.u32.totalorder %s1519_s17, %s1604_s6 }
 0x173   : > { %p1170_p6 = scmp.lt.u32.totalorder %s1168_s26, %s1164_s20  ;;  %p1172_p10 = scmp.lt.u32.totalorder %s1164_s20, %s1519_s17 }
 0x174   : > { %p1166_p11 = pnand %p1165_p5, %p1400_p12 }
 0x175   : > { %p1171_p8 = por %p1170_p6, %p1169_p4 }
 0x176   : > { %p1167_p2 = pneg %p1166_p11 }
 0x177   : > { %p1173_p13 = por %p1172_p10, %p1171_p8 }
 0x179   : > { %p1174_p3 = pnand %p1173_p13, %p1167_p2 }
 0x17b   : > { %1177 = shalt.err (!%p1174_p3)
}
 0x17c   : > { %999 = dma.vmem_to_hbm [thread:$0]  (%p1400_p12), %s1521_s13, 16, %s1519_s17, %s1530_s12   ;;  %641 = vst [vmem:[%s327_s28] sm:$0x1] %v640_v5 }
 0x17d   : > { %s1178_s8 = scalar_lea.vmem %s1528_s22, 16  ;;  %s1263_s30 = smov [#allocation11]  }
 0x17e   : > { %p1179_p7 = scmp.ne.s32.totalorder %s1528_s22, %s1178_s8  ;;  %s1182_s10 = sshll.u32 %s1263_s30, 4  ;;  %s1183_s10 = int_to_ptr.vmem [resolvable:$false] %s1182_s10 }
 0x17f   : > { %s1184_s20 = scalar_lea.vmem %s1183_s10, 32  ;;  %p1185_p0 = scmp.lt.s32.totalorder %s1528_s22, %s1183_s10 }
 0x180   : > { %p1180_p9 = pnand %p1179_p7, %p1400_p12  ;;  %p1186_p5 = scmp.lt.s32.totalorder %s1184_s20, %s1178_s8 }
 0x182   : > { %p1181_p1 = pneg %p1180_p9  ;;  %p1187_p11 = por %p1186_p5, %p1185_p0 }
 0x184   : > { %p1188_p2 = pnand %p1187_p11, %p1181_p1 }
 0x186   : > { %1191 = shalt.err (!%p1188_p2)
}
 0x187   : > { %s1192_s14 = scalar_lea.hbm %s1526_s21, 16  ;;  %s1196_s17 = scalar_lea.hbm %s1605_s7, 32 }
 0x188   : > { %p1193_p4 = scmp.ne.s32.totalorder %s1526_s21, %s1192_s14  ;;  %p1197_p10 = scmp.lt.u32.totalorder %s1526_s21, %s1605_s7 }
 0x189   : > { %p1198_p13 = scmp.lt.u32.totalorder %s1196_s17, %s1192_s14  ;;  %p1200_p7 = scmp.lt.u32.totalorder %s1192_s14, %s1526_s21 }
 0x18a   : > { %p1194_p6 = pnand %p1193_p4, %p1400_p12 }
 0x18b   : > { %p1199_p3 = por %p1198_p13, %p1197_p10 }
 0x18c   : > { %p1195_p8 = pneg %p1194_p6 }
 0x18d   : > { %p1201_p9 = por %p1200_p7, %p1199_p3 }
 0x18f   : > { %p1202_p1 = pnand %p1201_p9, %p1195_p8 }
 0x191   : > { %1205 = shalt.err (!%p1202_p1)
}
 0x192   : > { %1000 = dma.vmem_to_hbm [thread:$0]  (%p1400_p12), %s1528_s22, 16, %s1526_s21, %s1530_s12  }
 0x193 PF: > { %s705_s26 = sand.u32 1, %s1240_s1   ;;  %p1620_p0 = scmp.ne.s32.totalorder %s1610_s29, 0 }
 0x194   : > { %p1621_p5 = scmp.ge.s32.totalorder %s1252_s25, 2  ;;  %s706_s23 = scalar_lea.sflag [#allocation5], %s705_s26 }
 0x196   : > { %p1013_p11 = pnand %p1621_p5, %p1620_p0 }
 0x198   : > { %1231 = dma.done.wait (!%p1013_p11), %s706_s23, 256  }
 0x199   : > { %1233 = vsyncadd (!%p1013_p11), %s706_s23, 4294967040  ;;  %s714_s18 = sand.u32 1, %s826_s27  }
 0x19a   : > { %s715_s8 = scalar_lea.sflag [#allocation10], %s714_s18 }
 0x19b   : > { %1235 = dma.done.wait (!%p1013_p11), %s715_s8, 32  }
 0x19c   : > { %1237 = vsyncadd (!%p1013_p11), %s715_s8, 4294967264  ;;  %p25_p12 = scmp.ge.s32.totalorder %s1362_s11, 4   ;;  %s1622_s1 = smov %s1244_s2 }
 0x19d   : > { %s1623_s2 = smov %s1248_s24  ;;  %s1624_s24 = smov %s1396_s15 }
 0x19e   : > { %s1625_s25 = smov %s1362_s11  ;;  %27 = sbr.rel (!%p25_p12) target bundleno = 8 (0x8), region = 123 }
 0x1a5   :  { %727 = vsyncpa [#allocation4], 1 }
 0x1a6   :  { %729 = vsyncpa [#allocation4 + $0x1], 1 }
 0x1a7   :  { %730 = vsyncpa [#allocation7], 1 }
 0x1a8   :  { %731 = vsyncpa [#allocation5], 1 }
 0x1a9   :  { %733 = vsyncpa [#allocation5 + $0x1], 1 }
 0x1aa   :  { %734 = vsyncpa [#allocation10], 1 }
 0x1ab   :  { %736 = vsyncpa [#allocation10 + $0x1], 1 }

</bundles_post_ra>
